<compile_context>
chip_gen: v7x
topology: tpu7x:2x2x1
jax: 0.10.0
libtpu: 0.0.40
codegen_flags: <defaults>
</compile_context>

<pallas_src>
import functools

import jax
import jax.numpy as jnp
import numpy as np
from jax.experimental import pallas as pl
from jax.experimental.pallas import tpu as pltpu


def _round_up(n, m):
    return ((n + m - 1) // m) * m


def _pad_to(a, shape):
    pads = [(0, s - d) for d, s in zip(a.shape, shape)]
    if any(p[1] for p in pads):
        a = jnp.pad(a, pads)
    return a


def _choose_tile_hw(b_block, c, hw, dtype_bytes, target_bytes=8 * 1024 * 1024):
    """Largest lane-aligned (multiple of 128) HW tile with ~target_bytes per buffer."""
    row_bytes = max(1, b_block * c * dtype_bytes)  # bytes per unit of HW in one tile
    max_hw = max(128, target_bytes // row_bytes)
    tile = max(128, (max_hw // 128) * 128)
    tile = min(tile, _round_up(hw, 128))
    return tile


def _make_senet_kernel(inv_hw):
    def kernel(x_ref, w1_ref, b1_ref, w2_ref, b2_ref, o_ref, acc_ref):
        k = pl.program_id(1)

        @pl.when(k == 0)
        def _init():
            acc_ref[...] = jnp.zeros_like(acc_ref)

        # x_ref: (tb, C, tile_hw) -> accumulate spatial sum into f32 scratch.
        acc_ref[...] += jnp.sum(x_ref[...].astype(jnp.float32), axis=-1)

        @pl.when(k == pl.num_programs(1) - 1)
        def _finalize():
            pooled = acc_ref[...] * inv_hw                              # (tb, C)
            h = jnp.dot(pooled, w1_ref[...],
                        preferred_element_type=jnp.float32) + b1_ref[...]
            h = jnp.maximum(h, 0.0)
            y = jnp.dot(h, w2_ref[...],
                        preferred_element_type=jnp.float32) + b2_ref[...]
            o_ref[...] = jax.nn.sigmoid(y)

    return kernel


@functools.partial(jax.jit, static_argnames=())
def senet_forward(x, w1, b1, w2, b2):
    """x: (B, C, H, W); w1: (C, Ch); b1: (1, Ch); w2: (Ch, C); b2: (1, C)."""
    B, C, H, W = x.shape
    Ch = w1.shape[1]
    HW = H * W

    # Lane-dense padding of the tiny MLP dims (zero-padded => semantics preserved).
    Chp = max(128, _round_up(Ch, 128))
    Cp = max(128, _round_up(C, 128))
    w1p = _pad_to(w1.astype(jnp.float32), (C, Chp))
    b1p = _pad_to(b1.astype(jnp.float32), (1, Chp))
    w2p = _pad_to(w2.astype(jnp.float32), (Chp, Cp))
    b2p = _pad_to(b2.astype(jnp.float32), (1, Cp))

    # Batch tile: keep whole batch if it is small / not 8-divisible.
    tb = 8 if (B % 8 == 0 and B > 8) else B
    num_b = B // tb

    # Flatten spatial dims lane-dense and tile the reduction axis.
    x_flat = x.reshape(B, C, HW)
    tile_hw = _choose_tile_hw(tb, C, HW, x.dtype.itemsize)
    hw_pad = _round_up(HW, tile_hw)
    if hw_pad != HW:
        # Zero padding does not change the spatial sum; mean divides by true HW.
        x_flat = jnp.pad(x_flat, ((0, 0), (0, 0), (0, hw_pad - HW)))
    num_k = hw_pad // tile_hw

    out_padded = pl.pallas_call(
        _make_senet_kernel(1.0 / float(HW)),
        out_shape=jax.ShapeDtypeStruct((B, Cp), jnp.float32),
        grid=(num_b, num_k),
        in_specs=[
            pl.BlockSpec((tb, C, tile_hw), lambda b, k: (b, 0, k)),
            pl.BlockSpec((C, Chp), lambda b, k: (0, 0)),
            pl.BlockSpec((1, Chp), lambda b, k: (0, 0)),
            pl.BlockSpec((Chp, Cp), lambda b, k: (0, 0)),
            pl.BlockSpec((1, Cp), lambda b, k: (0, 0)),
        ],
        out_specs=pl.BlockSpec((tb, Cp), lambda b, k: (b, 0)),
        scratch_shapes=[pltpu.VMEM((tb, C), jnp.float32)],
        compiler_params=pltpu.CompilerParams(
            dimension_semantics=("parallel", "arbitrary"),
            vmem_limit_bytes=48 * 1024 * 1024,
        ),
    )(x_flat, w1p, b1p, w2p, b2p)

    return out_padded[:, :C]


def senet_reference(x, w1, b1, w2, b2):
    pooled = jnp.mean(x.astype(jnp.float32), axis=(2, 3))
    h = jnp.maximum(pooled @ w1 + b1, 0.0)
    y = h @ w2 + b2
    return jax.nn.sigmoid(y)


if __name__ == "__main__":
    # Small shapes consistent with the module: B=2, C=4, H=W=16, scale=2.
    B, C, H, W = 2, 4, 16, 16
    scale = 2
    Ch = C // scale  # hidden = 2

    key = jax.random.PRNGKey(0)
    kx, k1, kb1, k2, kb2 = jax.random.split(key, 5)

    x = jax.random.normal(kx, (B, C, H, W), dtype=jnp.float32)

    # PyTorch Linear weight is (out, in); we store the transposed (in, out) form.
    w1 = jax.random.normal(k1, (C, Ch), dtype=jnp.float32) * 0.5
    b1 = jax.random.normal(kb1, (1, Ch), dtype=jnp.float32) * 0.1
    w2 = jax.random.normal(k2, (Ch, C), dtype=jnp.float32) * 0.5
    b2 = jax.random.normal(kb2, (1, C), dtype=jnp.float32) * 0.1

    out = senet_forward(x, w1, b1, w2, b2)
    out = jax.block_until_ready(out)

    ref = senet_reference(x, w1, b1, w2, b2)
    assert out.shape == (B, C)
    np.testing.assert_allclose(np.asarray(out), np.asarray(ref), rtol=1e-5, atol=1e-5)

    print("KERNEL_OK")
</pallas_src>

<mosaic_0001>
module attributes {stable_mosaic.version = 11 : i64} {
  func.func @kernel(%arg0: i32, %arg1: i32, %arg2: memref<2x4x256xf32, #tpu.memory_space<vmem>>, %arg3: memref<4x128xf32, #tpu.memory_space<vmem>>, %arg4: memref<1x128xf32, #tpu.memory_space<vmem>>, %arg5: memref<128x128xf32, #tpu.memory_space<vmem>>, %arg6: memref<1x128xf32, #tpu.memory_space<vmem>>, %arg7: memref<2x128xf32, #tpu.memory_space<vmem>>, %arg8: memref<2x4xf32, #tpu.memory_space<vmem>>) attributes {dimension_semantics = [#tpu.dimension_semantics<parallel>, #tpu.dimension_semantics<arbitrary>], iteration_bounds = array<i64: 1, 1>, scalar_prefetch = 0 : i64, scratch_operands = 1 : i64, tpu.core_type = #tpu.core_type<tc>, window_params = [{transform_indices = @transform_0, window_bounds = array<i64: 2, 4, 256>}, {pipeline_mode = #tpu.pipeline_mode<synchronous>, transform_indices = @transform_1, window_bounds = array<i64: 4, 128>}, {pipeline_mode = #tpu.pipeline_mode<synchronous>, transform_indices = @transform_2, window_bounds = array<i64: 1, 128>}, {pipeline_mode = #tpu.pipeline_mode<synchronous>, transform_indices = @transform_3, window_bounds = array<i64: 128, 128>}, {pipeline_mode = #tpu.pipeline_mode<synchronous>, transform_indices = @transform_4, window_bounds = array<i64: 1, 128>}, {transform_indices = @transform_5, window_bounds = array<i64: 2, 128>}]} {
    %c0_i32 = arith.constant 0 : i32
    %0 = arith.cmpi eq, %arg1, %c0_i32 : i32
    %1 = arith.extui %0 : i1 to i32
    %c0_i32_0 = arith.constant 0 : i32
    %2 = arith.cmpi ne, %1, %c0_i32_0 : i32
    scf.if %2 {
      %cst_9 = arith.constant 0.000000e+00 : f32
      %11 = vector.broadcast %cst_9 : f32 to vector<2x4xf32>
      %c0_10 = arith.constant 0 : index
      %c0_11 = arith.constant 0 : index
      %12 = vector.load %arg8[%c0_10, %c0_11] : memref<2x4xf32, #tpu.memory_space<vmem>>, vector<2x4xf32>
      tpu.vector_store %arg8[%c0_10, %c0_11], %11 {strides = array<i32>} : memref<2x4xf32, #tpu.memory_space<vmem>>, vector<2x4xf32>,
    } else {
    }
    %c0 = arith.constant 0 : index
    %c0_1 = arith.constant 0 : index
    %3 = vector.load %arg8[%c0, %c0_1] : memref<2x4xf32, #tpu.memory_space<vmem>>, vector<2x4xf32>
    %c0_2 = arith.constant 0 : index
    %c0_3 = arith.constant 0 : index
    %c0_4 = arith.constant 0 : index
    %4 = vector.load %arg2[%c0_2, %c0_3, %c0_4] : memref<2x4x256xf32, #tpu.memory_space<vmem>>, vector<2x4x256xf32>
    %cst = arith.constant dense<0.000000e+00> : vector<2x4xf32>
    %5 = vector.multi_reduction <add>, %4, %cst [2] : vector<2x4x256xf32> to vector<2x4xf32>
    %6 = arith.addf %3, %5 : vector<2x4xf32>
    %c0_5 = arith.constant 0 : index
    %c0_6 = arith.constant 0 : index
    %7 = vector.load %arg8[%c0_5, %c0_6] : memref<2x4xf32, #tpu.memory_space<vmem>>, vector<2x4xf32>
    tpu.vector_store %arg8[%c0_5, %c0_6], %6 {strides = array<i32>} : memref<2x4xf32, #tpu.memory_space<vmem>>, vector<2x4xf32>,
    %c0_i32_7 = arith.constant 0 : i32
    %8 = arith.cmpi eq, %arg1, %c0_i32_7 : i32
    %9 = arith.extui %8 : i1 to i32
    %c0_i32_8 = arith.constant 0 : i32
    %10 = arith.cmpi ne, %9, %c0_i32_8 : i32
    scf.if %10 {
      %c0_9 = arith.constant 0 : index
      %c0_10 = arith.constant 0 : index
      %11 = vector.load %arg8[%c0_9, %c0_10] : memref<2x4xf32, #tpu.memory_space<vmem>>, vector<2x4xf32>
      %cst_11 = arith.constant 3.906250e-03 : f32
      %12 = vector.broadcast %cst_11 : f32 to vector<2x4xf32>
      %13 = arith.mulf %11, %12 : vector<2x4xf32>
      %c0_12 = arith.constant 0 : index
      %c0_13 = arith.constant 0 : index
      %14 = vector.load %arg3[%c0_12, %c0_13] : memref<4x128xf32, #tpu.memory_space<vmem>>, vector<4x128xf32>
      %cst_14 = arith.constant dense<0.000000e+00> : vector<2x128xf32>
      %15 = tpu.matmul %13, %14, %cst_14 {dimension_numbers = #tpu.dot_dimension_numbers<[1], [0], [0], [1], [0, 0, 1, 1], [], []>} : vector<2x4xf32>, vector<4x128xf32>, vector<2x128xf32> -> vector<2x128xf32>
      %c0_15 = arith.constant 0 : index
      %c0_16 = arith.constant 0 : index
      %16 = vector.load %arg4[%c0_15, %c0_16] : memref<1x128xf32, #tpu.memory_space<vmem>>, vector<1x128xf32>
      %17 = vector.broadcast %16 : vector<1x128xf32> to vector<2x128xf32>
      %18 = arith.addf %15, %17 : vector<2x128xf32>
      %cst_17 = arith.constant 0.000000e+00 : f32
      %19 = vector.broadcast %cst_17 : f32 to vector<2x128xf32>
      %20 = arith.maximumf %18, %19 : vector<2x128xf32>
      %c0_18 = arith.constant 0 : index
      %c0_19 = arith.constant 0 : index
      %21 = vector.load %arg5[%c0_18, %c0_19] : memref<128x128xf32, #tpu.memory_space<vmem>>, vector<128x128xf32>
      %cst_20 = arith.constant dense<0.000000e+00> : vector<2x128xf32>
      %22 = tpu.matmul %20, %21, %cst_20 {dimension_numbers = #tpu.dot_dimension_numbers<[1], [0], [0], [1], [0, 0, 1, 1], [], []>} : vector<2x128xf32>, vector<128x128xf32>, vector<2x128xf32> -> vector<2x128xf32>
      %c0_21 = arith.constant 0 : index
      %c0_22 = arith.constant 0 : index
      %23 = vector.load %arg6[%c0_21, %c0_22] : memref<1x128xf32, #tpu.memory_space<vmem>>, vector<1x128xf32>
      %24 = vector.broadcast %23 : vector<1x128xf32> to vector<2x128xf32>
      %25 = arith.addf %22, %24 : vector<2x128xf32>
      %26 = arith.negf %25 : vector<2x128xf32>
      %27 = math.exp %26 : vector<2x128xf32>
      %cst_23 = arith.constant 1.000000e+00 : f32
      %28 = vector.broadcast %cst_23 : f32 to vector<2x128xf32>
      %29 = arith.addf %28, %27 : vector<2x128xf32>
      %30 = arith.divf %28, %29 : vector<2x128xf32>
      %c0_24 = arith.constant 0 : index
      %c0_25 = arith.constant 0 : index
      %31 = vector.load %arg7[%c0_24, %c0_25] : memref<2x128xf32, #tpu.memory_space<vmem>>, vector<2x128xf32>
      tpu.vector_store %arg7[%c0_24, %c0_25], %30 {strides = array<i32>} : memref<2x128xf32, #tpu.memory_space<vmem>>, vector<2x128xf32>,
    } else {
    }
    return
  }
  func.func @transform_0(%arg0: i32, %arg1: i32) -> (i32, i32, i32) {
    %c0_i32 = arith.constant 0 : i32
    %c0_i32_0 = arith.constant 0 : i32
    return %arg0, %c0_i32, %arg1 : i32, i32, i32
  }
  func.func @transform_1(%arg0: i32, %arg1: i32) -> (i32, i32) {
    %c0_i32 = arith.constant 0 : i32
    %c0_i32_0 = arith.constant 0 : i32
    %c0_i32_1 = arith.constant 0 : i32
    return %c0_i32, %c0_i32_0 : i32, i32
  }
  func.func @transform_2(%arg0: i32, %arg1: i32) -> (i32, i32) {
    %c0_i32 = arith.constant 0 : i32
    %c0_i32_0 = arith.constant 0 : i32
    %c0_i32_1 = arith.constant 0 : i32
    return %c0_i32, %c0_i32_0 : i32, i32
  }
  func.func @transform_3(%arg0: i32, %arg1: i32) -> (i32, i32) {
    %c0_i32 = arith.constant 0 : i32
    %c0_i32_0 = arith.constant 0 : i32
    %c0_i32_1 = arith.constant 0 : i32
    return %c0_i32, %c0_i32_0 : i32, i32
  }
  func.func @transform_4(%arg0: i32, %arg1: i32) -> (i32, i32) {
    %c0_i32 = arith.constant 0 : i32
    %c0_i32_0 = arith.constant 0 : i32
    %c0_i32_1 = arith.constant 0 : i32
    return %c0_i32, %c0_i32_0 : i32, i32
  }
  func.func @transform_5(%arg0: i32, %arg1: i32) -> (i32, i32) {
    %c0_i32 = arith.constant 0 : i32
    %c0_i32_0 = arith.constant 0 : i32
    return %arg0, %c0_i32 : i32, i32
  }
}

</mosaic_0001>

<bundles_post_ra>
// kernel: senet_forward.1
= control target key start
LH: loop header
LB: loop body
LE: loop exit
PB: predicated region body
PF: predicated region fallthrough
CT: control target
= control target key end

     0   :  { %vm36_vm0 = vcmask 1043456   ;;  %s508_s0 = inlined_call_operand.vmem [shape: f32[2,4,256], index: 0, kind: input, shape index: {}]   ;;  %s509_s1 = inlined_call_operand.vmem [shape: f32[4,128], index: 1, kind: input, shape index: {}]   ;;  %s510_s2 = inlined_call_operand.vmem [shape: f32[1,128], index: 2, kind: input, shape index: {}]   ;;  %s511_s3 = inlined_call_operand.vmem [shape: f32[128,128], index: 3, kind: input, shape index: {}]   ;;  %s512_s4 = inlined_call_operand.vmem [shape: f32[1,128], index: 4, kind: input, shape index: {}]   ;;  %s513_s5 = inlined_call_operand.hbm [shape: f32[2,128], index: 5, kind: output, shape index: {}]  }
   0x1   :  { %v28_v0 = vld [vmem:[%s508_s0] sm:$0xff]  ;;  %v29_v1 = vld [vmem:[%s508_s0 + $0x8] sm:$0xff] }
   0x2   :  { %10 = vsyncpa [#allocation4], 0  ;;  %v32_v2 = vcombine.high %v28_v0, %v28_v0  ;;  %v37_v3 = vsel %vm36_vm0, %v28_v0, 0.0  ;;  %v33_v4 = vcombine.high %v29_v1, %v29_v1  ;;  %v42_v6 = vsel %vm36_vm0, %v29_v1, 0.0  ;;  %v70_v11 = vld [vmem:[%s509_s1] sm:$0xf] }
   0x3   :  { %vm25_vm1 = vcmask 25600   ;;  %v392_v10 = vmov 0.0   ;;  %vm393_vm2 = vmmov 0   ;;  %v156_v12 = vld [vmem:[%s511_s3] sm:$0xff]  ;;  %v157_v13 = vld [vmem:[%s511_s3 + $0x8] sm:$0xff]  ;;  %v158_v14 = vld [vmem:[%s511_s3 + $0x10] sm:$0xff]  ;;  %v49_v34 = vlaneseq }
   0x4   :  { %v38_v5 = vsel %vm36_vm0, %v32_v2, 0.0  ;;  %v43_v7 = vsel %vm36_vm0, %v33_v4, 0.0  ;;  %26 = vst.msk [vmem:[#allocation2] sm:$0x3] %vm25_vm1, %v392_v10  ;;  %294 = vmatprep.subr.mxu0 %v392_v10  ;;  %296 = vmatprep.mubr.msk.f32.mxu0 %vm393_vm2, %v392_v10  ;;  %v394_v15 = vmov 0.0|0.0   ;;  %v335_v16 = vpack.c.bf16 %v157_v13, %v156_v12  ;;  %v159_v17 = vld [vmem:[%s511_s3 + $0x18] sm:$0xff] }
   0x5   :  { %v39_v8 = vadd.f32 %v38_v5, %v37_v3  ;;  %v44_v9 = vadd.f32 %v43_v7, %v42_v6  ;;  %295 = vmatpush3.msk.msra.mxu0 %vm36_vm0, %v70_v11  ;;  %331 = vmatprep.mubr.msk.f32.mxu1 %vm393_vm2, %v392_v10  ;;  %v338_v18 = vpack.c.bf16 %v159_v17, %v158_v14  ;;  %v160_v19 = vld [vmem:[%s511_s3 + $0x20] sm:$0xff]  ;;  %v161_v20 = vld [vmem:[%s511_s3 + $0x28] sm:$0xff]  ;;  %v162_v22 = vld [vmem:[%s511_s3 + $0x30] sm:$0xff]  ;;  %v50_v35 = vand.u32 127, %v49_v34 }
   0x6   :  { %334 = vmatprep.subr.bf16.mxu1 %v394_v15  ;;  %v341_v21 = vpack.c.bf16 %v161_v20, %v160_v19  ;;  %v163_v23 = vld [vmem:[%s511_s3 + $0x38] sm:$0xff]  ;;  %v164_v25 = vld [vmem:[%s511_s3 + $0x40] sm:$0xff]  ;;  %v165_v26 = vld [vmem:[%s511_s3 + $0x48] sm:$0xff]  ;;  %v52_v36 = vshrl.u32 %v49_v34, 7  ;;  %vm59_vm3 = vcmask 1041409   ;;  %vm78_vm4 = vcmask 31744  }
   0x7   :  { %40 = vadd.xlane.f32.xlu0 %v39_v8  ;;  %336 = vmatpush3.bf16.msra.mxu1 %v335_v16  ;;  %v344_v24 = vpack.c.bf16 %v163_v23, %v162_v22  ;;  %v347_v27 = vpack.c.bf16 %v165_v26, %v164_v25  ;;  %v166_v28 = vld [vmem:[%s511_s3 + $0x50] sm:$0xff]  ;;  %v167_v29 = vld [vmem:[%s511_s3 + $0x58] sm:$0xff]  ;;  %v168_v31 = vld [vmem:[%s511_s3 + $0x60] sm:$0xff] }
   0x8   :  { %337 = vmatprep.subr.bf16.mxu1 %v394_v15  ;;  %v350_v30 = vpack.c.bf16 %v167_v29, %v166_v28  ;;  %v169_v32 = vld [vmem:[%s511_s3 + $0x68] sm:$0xff]  ;;  %v53_v38 = vsub.s32 %v50_v35, %v52_v36  ;;  %v170_v47 = vld [vmem:[%s511_s3 + $0x70] sm:$0xff]  ;;  %v171_v48 = vld [vmem:[%s511_s3 + $0x78] sm:$0xff]  ;;  %s395_s3 = smov [#allocation3]  }
   0x9   :  { %v353_v33 = vpack.c.bf16 %v169_v32, %v168_v31  ;;  %v356_v49 = vpack.c.bf16 %v171_v48, %v170_v47  ;;  %v270_v50 = vld [vmem:[%s510_s2] ss:$0 sm:$0xff]  ;;  %s262_s6 = sshll.u32 %s395_s3, 4  ;;  %s263_s6 = int_to_ptr.vmem [resolvable:$true] %s262_s6 }
   0xa   :  { %v273_v55 = vld [vmem:[%s512_s4] ss:$0 sm:$0xff]  ;;  %s368_s2 = scalar_lea.vmem %s263_s6, 32  ;;  %p373_p1 = scmp.lt.s32.totalorder %s263_s6, %s263_s6 }
   0xb   :  { %45 = vadd.xlane.f32.xlu0 %v44_v9  ;;  %339 = vmatpush3.bf16.msra.mxu1 %v338_v18  ;;  %v27_v42 = vld [vmem:[#allocation2] sm:$0x3]  ;;  %p369_p0 = scmp.ne.s32.totalorder %s263_s6, %s368_s2  ;;  %p374_p2 = scmp.lt.s32.totalorder %s368_s2, %s368_s2 }
   0xc   :  { %340 = vmatprep.subr.bf16.mxu1 %v394_v15 }
   0xd   :  { %p375_p3 = por %p374_p2, %p373_p1 }
   0xf   :  { %342 = vmatpush3.bf16.msra.mxu1 %v341_v21  ;;  %p376_p4 = pnand %p375_p3, %p369_p0 }
  0x10   :  { %343 = vmatprep.subr.bf16.mxu1 %v394_v15 }
  0x13   :  { %345 = vmatpush3.bf16.msra.mxu1 %v344_v24 }
  0x14   :  { %346 = vmatprep.subr.bf16.mxu1 %v394_v15 }
  0x17   :  { %348 = vmatpush3.bf16.msra.mxu1 %v347_v27 }
  0x18   :  { %349 = vmatprep.subr.bf16.mxu1 %v394_v15 }
  0x1b   :  { %351 = vmatpush3.bf16.msra.mxu1 %v350_v30 }
  0x1c   :  { %352 = vmatprep.subr.bf16.mxu1 %v394_v15 }
  0x1f   :  { %354 = vmatpush3.bf16.msra.mxu1 %v353_v33 }
  0x20   :  { %355 = vmatprep.subr.bf16.mxu1 %v394_v15 }
  0x23   :  { %357 = vmatpush3.bf16.msra.mxu1 %v356_v49 }
  0x94   :  { %v41_v37 = vpop.xlane.xlu0 %40 }
  0x95   :  { %v54_v40 = vrot.slane %v41_v37, %v53_v38 }
  0x98   :  { %v46_v39 = vpop.xlane.xlu0 %45 }
  0x99   :  { %v58_v41 = vrot.slane %v46_v39, %v53_v38 }
  0x9b   :  { %v60_v43 = vsel %vm59_vm3, %v58_v41, %v54_v40 }
  0x9c   :  { %v62_v44 = vadd.f32 %v60_v43, %v27_v42 }
  0x9e   :  { %64 = vst.msk [vmem:[#allocation2] sm:$0x3] %vm25_vm1, %v62_v44 }
  0xa5   :  { %v68_v45 = vld [vmem:[#allocation2] sm:$0x3] }
  0xa6   :  { %v69_v46 = vmul.f32 0.00390625, %v68_v45 }
  0xa8   :  { %297 = vmatmul.mubr.msk.f32.vlgmr.msra.gmra.mrb[0].mxu0 %vm78_vm4, %v69_v46 }
 0x17b   :  { %v151_v51 = vpop.f32.mrb[0].mxu0 }
 0x17c   :  { %v152_v52 = vadd.f32 %v270_v50, %v151_v51  ;;  %v298_v53 = vpop.f32.mrb[1].mxu0 }
 0x17e   :  { %v155_v54 = vmax.f32 %v152_v52, 0.0 }
 0x180   :  { %332 = vmatmul.mubr.f32.vlgmr.msra.gmra.mrb[0].mxu1 %v155_v54 }
 0x253   :  { %v245_v56 = vpop.f32.mrb[0].mxu1 }
 0x254   :  { %v246_v57 = vadd.f32 %v273_v55, %v245_v56  ;;  %v333_v58 = vpop.f32.mrb[1].mxu1 }
 0x256   :  { %v274_v59 = vmul.f32 -1.442695, %v246_v57 }
 0x258   :  { %364 = vpow2.f32 %v274_v59 }
 0x262   :  { %v365_v60 = vpop.eup %364 }
 0x263   :  { %v252_v61 = vadd.f32 1.0, %v365_v60 }
 0x265   :  { %366 = vrcp.f32 %v252_v61 }
 0x26f   :  { %v367_v62 = vpop.eup %366 }
 0x270   :  { %255 = vst [vmem:[#allocation3] sm:$0x3] %v367_v62 }
 0x271   :  { %379 = shalt.err (!%p376_p4)
}
 0x272   :  { %s380_s8 = scalar_lea.hbm %s513_s5, 32 }
 0x273   :  { %p381_p5 = scmp.ne.s32.totalorder %s513_s5, %s380_s8  ;;  %p384_p6 = scmp.lt.u32.totalorder %s380_s8, %s513_s5 }
 0x275   :  { %p386_p7 = pnand %p384_p6, %p381_p5 }
 0x277   :  { %389 = shalt.err (!%p386_p7)
}
 0x278   :  { %265 = dma.vmem_to_hbm [thread:$0]  %s263_s6, 32, %s513_s5, [#allocation4]  }
 0x279   :  { %390 = dma.done.wait [#allocation4], 32  }
 0x27a   :  { %391 = vsyncadd [#allocation4], 4294967264 }
 0x27b   :  { %269 = vsyncpa [#allocation4], 1 }

</bundles_post_ra>
